<compile_context>
chip_gen: v7x
topology: tpu7x:2x2x1
jax: 0.10.0
libtpu: 0.0.40
codegen_flags: <defaults>
</compile_context>

<pallas_src>
import functools

import jax
import jax.numpy as jnp
from jax.experimental import pallas as pl
from jax.experimental.pallas import tpu as pltpu

ENV_SIZE = 3
WF_SIZE = 16
H1, H2, H3 = 24, 32, 64


def _round_up(x, m):
    return ((x + m - 1) // m) * m


def mlp_kernel(x_ref, w1_ref, b1_ref, w2_ref, b2_ref, w3_ref, b3_ref,
               w4_ref, b4_ref, o_ref):
    """Fused 4-layer MLP with ReLU between layers.

    Layer 1 has K=ENV_SIZE=3, so it is done as broadcast FMAs on the VPU
    (an MXU pass at 2% systolic depth is pure latency).  Layers 2-4 hit the
    MXU with f32 accumulation; operands may be bf16 (compute_dtype).
    """
    mxu_dtype = w2_ref.dtype

    # ---- Layer 1 on the VPU: h = sum_k x[:, k] * w1[k, :] + b1 ----
    x = x_ref[...].astype(jnp.float32)          # (bt, 3)
    w1 = w1_ref[...].astype(jnp.float32)        # (3, H1)
    h = b1_ref[...]                             # (1, H1) -> broadcasts
    for k in range(ENV_SIZE):                   # static, fully unrolled
        h = h + x[:, k:k + 1] * w1[k:k + 1, :]
    h = jnp.maximum(h, 0.0)

    # ---- Layers 2-4 on the MXU (f32 accumulation) ----
    h = jnp.dot(h.astype(mxu_dtype), w2_ref[...],
                preferred_element_type=jnp.float32) + b2_ref[...]
    h = jnp.maximum(h, 0.0)
    h = jnp.dot(h.astype(mxu_dtype), w3_ref[...],
                preferred_element_type=jnp.float32) + b3_ref[...]
    h = jnp.maximum(h, 0.0)
    y = jnp.dot(h.astype(mxu_dtype), w4_ref[...],
                preferred_element_type=jnp.float32) + b4_ref[...]

    o_ref[...] = y.astype(o_ref.dtype)


@functools.partial(jax.jit, static_argnames=("batch_tile", "compute_dtype"))
def net_forward(x, params, *, batch_tile=256, compute_dtype=jnp.float32):
    """x: (B, ENV_SIZE) f32.  params: dict of (in,out) weights / (1,out) biases.

    Returns (B, WF_SIZE) in x.dtype.  `compute_dtype=jnp.bfloat16` halves HBM
    traffic for x/weights and uses the bf16 MXU path (recommended on v6e/v7x).
    """
    B = x.shape[0]
    out_dtype = x.dtype

    # Pick an effective tile: multiple of 8 (sublane), no larger than needed.
    bt = _round_up(min(batch_tile, _round_up(B, 8)), 8)
    Bp = _round_up(B, bt)
    if Bp != B:
        x = jnp.pad(x, ((0, Bp - B), (0, 0)))   # masked tail via zero-padding

    x = x.astype(compute_dtype)
    w1 = params["w1"].astype(compute_dtype)
    w2 = params["w2"].astype(compute_dtype)
    w3 = params["w3"].astype(compute_dtype)
    w4 = params["w4"].astype(compute_dtype)
    b1 = params["b1"].astype(jnp.float32)
    b2 = params["b2"].astype(jnp.float32)
    b3 = params["b3"].astype(jnp.float32)
    b4 = params["b4"].astype(jnp.float32)

    def full(shape):
        # whole-array block, identical for every grid step (stays VMEM-resident)
        return pl.BlockSpec(shape, lambda i: (0, 0))

    out = pl.pallas_call(
        mlp_kernel,
        out_shape=jax.ShapeDtypeStruct((Bp, WF_SIZE), out_dtype),
        grid_spec=pltpu.PrefetchScalarGridSpec(
            num_scalar_prefetch=0,
            grid=(Bp // bt,),
            in_specs=[
                pl.BlockSpec((bt, ENV_SIZE), lambda i: (i, 0)),  # x tile
                full((ENV_SIZE, H1)), full((1, H1)),
                full((H1, H2)),       full((1, H2)),
                full((H2, H3)),       full((1, H3)),
                full((H3, WF_SIZE)),  full((1, WF_SIZE)),
            ],
            out_specs=pl.BlockSpec((bt, WF_SIZE), lambda i: (i, 0)),
        ),
        compiler_params=pltpu.CompilerParams(
            dimension_semantics=("parallel",)),  # megacore / dual-TC sharding
    )(x, w1, b1, w2, b2, w3, b3, w4, b4)

    return out[:B]


def init_params(key):
    """Deterministic synthetic init (uniform, torch-Linear-like fan-in scaling)."""
    dims = [(ENV_SIZE, H1), (H1, H2), (H2, H3), (H3, WF_SIZE)]
    params = {}
    for idx, (fan_in, fan_out) in enumerate(dims, start=1):
        key, kw, kb = jax.random.split(key, 3)
        bound = 1.0 / jnp.sqrt(float(fan_in))
        params[f"w{idx}"] = jax.random.uniform(
            kw, (fan_in, fan_out), jnp.float32, -bound, bound)
        params[f"b{idx}"] = jax.random.uniform(
            kb, (1, fan_out), jnp.float32, -bound, bound)
    return params


def net_reference(x, p):
    h = jnp.maximum(x @ p["w1"] + p["b1"], 0.0)
    h = jnp.maximum(h @ p["w2"] + p["b2"], 0.0)
    h = jnp.maximum(h @ p["w3"] + p["b3"], 0.0)
    return h @ p["w4"] + p["b4"]


if __name__ == "__main__":
    key = jax.random.PRNGKey(0)
    key, kx1, kx2 = jax.random.split(key, 3)
    params = init_params(key)

    # Test 1: small batch, f32, tight tolerance.
    B1 = 8
    x1 = jax.random.normal(kx1, (B1, ENV_SIZE), jnp.float32)
    out1 = jax.block_until_ready(net_forward(x1, params))
    ref1 = net_reference(x1, params)
    assert out1.shape == (B1, WF_SIZE)
    assert jnp.allclose(out1, ref1, atol=1e-5, rtol=1e-5)

    # Test 2: non-multiple-of-8 batch exercises the padding path, f32.
    B2 = 20
    x2 = jax.random.normal(kx2, (B2, ENV_SIZE), jnp.float32)
    out2 = jax.block_until_ready(net_forward(x2, params))
    ref2 = net_reference(x2, params)
    assert out2.shape == (B2, WF_SIZE)
    assert jnp.allclose(out2, ref2, atol=1e-5, rtol=1e-5)

    # Test 3: bf16 operand path (v6e/v7x fast path), relaxed tolerance.
    out3 = jax.block_until_ready(
        net_forward(x2, params, compute_dtype=jnp.bfloat16))
    assert out3.shape == (B2, WF_SIZE)
    assert jnp.allclose(out3, ref2, atol=5e-2, rtol=5e-2)

    print("KERNEL_OK")
</pallas_src>

<mosaic_0001>
module attributes {stable_mosaic.version = 11 : i64} {
  func.func @mlp_kernel(%arg0: i32, %arg1: memref<8x3xf32, #tpu.memory_space<vmem>>, %arg2: memref<3x24xf32, #tpu.memory_space<vmem>>, %arg3: memref<1x24xf32, #tpu.memory_space<vmem>>, %arg4: memref<24x32xf32, #tpu.memory_space<vmem>>, %arg5: memref<1x32xf32, #tpu.memory_space<vmem>>, %arg6: memref<32x64xf32, #tpu.memory_space<vmem>>, %arg7: memref<1x64xf32, #tpu.memory_space<vmem>>, %arg8: memref<64x16xf32, #tpu.memory_space<vmem>>, %arg9: memref<1x16xf32, #tpu.memory_space<vmem>>, %arg10: memref<8x16xf32, #tpu.memory_space<vmem>>) attributes {dimension_semantics = [#tpu.dimension_semantics<parallel>], iteration_bounds = array<i64: 1>, scalar_prefetch = 0 : i64, scratch_operands = 0 : i64, tpu.core_type = #tpu.core_type<tc>, window_params = [{transform_indices = @transform_0, window_bounds = array<i64: 8, 3>}, {pipeline_mode = #tpu.pipeline_mode<synchronous>, transform_indices = @transform_1, window_bounds = array<i64: 3, 24>}, {pipeline_mode = #tpu.pipeline_mode<synchronous>, transform_indices = @transform_2, window_bounds = array<i64: 1, 24>}, {pipeline_mode = #tpu.pipeline_mode<synchronous>, transform_indices = @transform_3, window_bounds = array<i64: 24, 32>}, {pipeline_mode = #tpu.pipeline_mode<synchronous>, transform_indices = @transform_4, window_bounds = array<i64: 1, 32>}, {pipeline_mode = #tpu.pipeline_mode<synchronous>, transform_indices = @transform_5, window_bounds = array<i64: 32, 64>}, {pipeline_mode = #tpu.pipeline_mode<synchronous>, transform_indices = @transform_6, window_bounds = array<i64: 1, 64>}, {pipeline_mode = #tpu.pipeline_mode<synchronous>, transform_indices = @transform_7, window_bounds = array<i64: 64, 16>}, {pipeline_mode = #tpu.pipeline_mode<synchronous>, transform_indices = @transform_8, window_bounds = array<i64: 1, 16>}, {transform_indices = @transform_9, window_bounds = array<i64: 8, 16>}]} {
    %c0 = arith.constant 0 : index
    %c0_0 = arith.constant 0 : index
    %0 = vector.load %arg1[%c0, %c0_0] : memref<8x3xf32, #tpu.memory_space<vmem>>, vector<8x3xf32>
    %c0_1 = arith.constant 0 : index
    %c0_2 = arith.constant 0 : index
    %1 = vector.load %arg2[%c0_1, %c0_2] : memref<3x24xf32, #tpu.memory_space<vmem>>, vector<3x24xf32>
    %c0_3 = arith.constant 0 : index
    %c0_4 = arith.constant 0 : index
    %2 = vector.load %arg3[%c0_3, %c0_4] : memref<1x24xf32, #tpu.memory_space<vmem>>, vector<1x24xf32>
    %3 = vector.extract_strided_slice %0 {offsets = [0, 0], sizes = [8, 1], strides = [1, 1]} : vector<8x3xf32> to vector<8x1xf32>
    %4 = vector.extract_strided_slice %1 {offsets = [0, 0], sizes = [1, 24], strides = [1, 1]} : vector<3x24xf32> to vector<1x24xf32>
    %5 = vector.broadcast %3 : vector<8x1xf32> to vector<8x24xf32>
    %6 = vector.broadcast %4 : vector<1x24xf32> to vector<8x24xf32>
    %7 = arith.mulf %5, %6 : vector<8x24xf32>
    %8 = vector.broadcast %2 : vector<1x24xf32> to vector<8x24xf32>
    %9 = arith.addf %8, %7 : vector<8x24xf32>
    %10 = vector.extract_strided_slice %0 {offsets = [0, 1], sizes = [8, 1], strides = [1, 1]} : vector<8x3xf32> to vector<8x1xf32>
    %11 = vector.extract_strided_slice %1 {offsets = [1, 0], sizes = [1, 24], strides = [1, 1]} : vector<3x24xf32> to vector<1x24xf32>
    %12 = vector.broadcast %10 : vector<8x1xf32> to vector<8x24xf32>
    %13 = vector.broadcast %11 : vector<1x24xf32> to vector<8x24xf32>
    %14 = arith.mulf %12, %13 : vector<8x24xf32>
    %15 = arith.addf %9, %14 : vector<8x24xf32>
    %16 = vector.extract_strided_slice %0 {offsets = [0, 2], sizes = [8, 1], strides = [1, 1]} : vector<8x3xf32> to vector<8x1xf32>
    %17 = vector.extract_strided_slice %1 {offsets = [2, 0], sizes = [1, 24], strides = [1, 1]} : vector<3x24xf32> to vector<1x24xf32>
    %18 = vector.broadcast %16 : vector<8x1xf32> to vector<8x24xf32>
    %19 = vector.broadcast %17 : vector<1x24xf32> to vector<8x24xf32>
    %20 = arith.mulf %18, %19 : vector<8x24xf32>
    %21 = arith.addf %15, %20 : vector<8x24xf32>
    %cst = arith.constant 0.000000e+00 : f32
    %22 = vector.broadcast %cst : f32 to vector<8x24xf32>
    %23 = arith.maximumf %21, %22 : vector<8x24xf32>
    %c0_5 = arith.constant 0 : index
    %c0_6 = arith.constant 0 : index
    %24 = vector.load %arg4[%c0_5, %c0_6] : memref<24x32xf32, #tpu.memory_space<vmem>>, vector<24x32xf32>
    %cst_7 = arith.constant dense<0.000000e+00> : vector<8x32xf32>
    %25 = tpu.matmul %23, %24, %cst_7 {dimension_numbers = #tpu.dot_dimension_numbers<[1], [0], [0], [1], [0, 0, 1, 1], [], []>} : vector<8x24xf32>, vector<24x32xf32>, vector<8x32xf32> -> vector<8x32xf32>
    %c0_8 = arith.constant 0 : index
    %c0_9 = arith.constant 0 : index
    %26 = vector.load %arg5[%c0_8, %c0_9] : memref<1x32xf32, #tpu.memory_space<vmem>>, vector<1x32xf32>
    %27 = vector.broadcast %26 : vector<1x32xf32> to vector<8x32xf32>
    %28 = arith.addf %25, %27 : vector<8x32xf32>
    %cst_10 = arith.constant 0.000000e+00 : f32
    %29 = vector.broadcast %cst_10 : f32 to vector<8x32xf32>
    %30 = arith.maximumf %28, %29 : vector<8x32xf32>
    %c0_11 = arith.constant 0 : index
    %c0_12 = arith.constant 0 : index
    %31 = vector.load %arg6[%c0_11, %c0_12] : memref<32x64xf32, #tpu.memory_space<vmem>>, vector<32x64xf32>
    %cst_13 = arith.constant dense<0.000000e+00> : vector<8x64xf32>
    %32 = tpu.matmul %30, %31, %cst_13 {dimension_numbers = #tpu.dot_dimension_numbers<[1], [0], [0], [1], [0, 0, 1, 1], [], []>} : vector<8x32xf32>, vector<32x64xf32>, vector<8x64xf32> -> vector<8x64xf32>
    %c0_14 = arith.constant 0 : index
    %c0_15 = arith.constant 0 : index
    %33 = vector.load %arg7[%c0_14, %c0_15] : memref<1x64xf32, #tpu.memory_space<vmem>>, vector<1x64xf32>
    %34 = vector.broadcast %33 : vector<1x64xf32> to vector<8x64xf32>
    %35 = arith.addf %32, %34 : vector<8x64xf32>
    %cst_16 = arith.constant 0.000000e+00 : f32
    %36 = vector.broadcast %cst_16 : f32 to vector<8x64xf32>
    %37 = arith.maximumf %35, %36 : vector<8x64xf32>
    %c0_17 = arith.constant 0 : index
    %c0_18 = arith.constant 0 : index
    %38 = vector.load %arg8[%c0_17, %c0_18] : memref<64x16xf32, #tpu.memory_space<vmem>>, vector<64x16xf32>
    %cst_19 = arith.constant dense<0.000000e+00> : vector<8x16xf32>
    %39 = tpu.matmul %37, %38, %cst_19 {dimension_numbers = #tpu.dot_dimension_numbers<[1], [0], [0], [1], [0, 0, 1, 1], [], []>} : vector<8x64xf32>, vector<64x16xf32>, vector<8x16xf32> -> vector<8x16xf32>
    %c0_20 = arith.constant 0 : index
    %c0_21 = arith.constant 0 : index
    %40 = vector.load %arg9[%c0_20, %c0_21] : memref<1x16xf32, #tpu.memory_space<vmem>>, vector<1x16xf32>
    %41 = vector.broadcast %40 : vector<1x16xf32> to vector<8x16xf32>
    %42 = arith.addf %39, %41 : vector<8x16xf32>
    %c0_22 = arith.constant 0 : index
    %c0_23 = arith.constant 0 : index
    %43 = vector.load %arg10[%c0_22, %c0_23] : memref<8x16xf32, #tpu.memory_space<vmem>>, vector<8x16xf32>
    tpu.vector_store %arg10[%c0_22, %c0_23], %42 {strides = array<i32>} : memref<8x16xf32, #tpu.memory_space<vmem>>, vector<8x16xf32>,
    return
  }
  func.func @transform_0(%arg0: i32) -> (i32, i32) {
    %c0_i32 = arith.constant 0 : i32
    %c0_i32_0 = arith.constant 0 : i32
    return %arg0, %c0_i32 : i32, i32
  }
  func.func @transform_1(%arg0: i32) -> (i32, i32) {
    %c0_i32 = arith.constant 0 : i32
    %c0_i32_0 = arith.constant 0 : i32
    %c0_i32_1 = arith.constant 0 : i32
    return %c0_i32, %c0_i32_0 : i32, i32
  }
  func.func @transform_2(%arg0: i32) -> (i32, i32) {
    %c0_i32 = arith.constant 0 : i32
    %c0_i32_0 = arith.constant 0 : i32
    %c0_i32_1 = arith.constant 0 : i32
    return %c0_i32, %c0_i32_0 : i32, i32
  }
  func.func @transform_3(%arg0: i32) -> (i32, i32) {
    %c0_i32 = arith.constant 0 : i32
    %c0_i32_0 = arith.constant 0 : i32
    %c0_i32_1 = arith.constant 0 : i32
    return %c0_i32, %c0_i32_0 : i32, i32
  }
  func.func @transform_4(%arg0: i32) -> (i32, i32) {
    %c0_i32 = arith.constant 0 : i32
    %c0_i32_0 = arith.constant 0 : i32
    %c0_i32_1 = arith.constant 0 : i32
    return %c0_i32, %c0_i32_0 : i32, i32
  }
  func.func @transform_5(%arg0: i32) -> (i32, i32) {
    %c0_i32 = arith.constant 0 : i32
    %c0_i32_0 = arith.constant 0 : i32
    %c0_i32_1 = arith.constant 0 : i32
    return %c0_i32, %c0_i32_0 : i32, i32
  }
  func.func @transform_6(%arg0: i32) -> (i32, i32) {
    %c0_i32 = arith.constant 0 : i32
    %c0_i32_0 = arith.constant 0 : i32
    %c0_i32_1 = arith.constant 0 : i32
    return %c0_i32, %c0_i32_0 : i32, i32
  }
  func.func @transform_7(%arg0: i32) -> (i32, i32) {
    %c0_i32 = arith.constant 0 : i32
    %c0_i32_0 = arith.constant 0 : i32
    %c0_i32_1 = arith.constant 0 : i32
    return %c0_i32, %c0_i32_0 : i32, i32
  }
  func.func @transform_8(%arg0: i32) -> (i32, i32) {
    %c0_i32 = arith.constant 0 : i32
    %c0_i32_0 = arith.constant 0 : i32
    %c0_i32_1 = arith.constant 0 : i32
    return %c0_i32, %c0_i32_0 : i32, i32
  }
  func.func @transform_9(%arg0: i32) -> (i32, i32) {
    %c0_i32 = arith.constant 0 : i32
    %c0_i32_0 = arith.constant 0 : i32
    return %arg0, %c0_i32 : i32, i32
  }
}

</mosaic_0001>

<bundles_post_ra>
// kernel: net_forward.1
= control target key start
LH: loop header
LB: loop body
LE: loop exit
PB: predicated region body
PF: predicated region fallthrough
CT: control target
= control target key end

     0   :  { %v470_v1 = vmov 0   ;;  %v471_v2 = vmov 2   ;;  %s605_s0 = inlined_call_operand.vmem [shape: f32[8,3], index: 0, kind: input, shape index: {}]   ;;  %s606_s1 = inlined_call_operand.vmem [shape: f32[3,24], index: 1, kind: input, shape index: {}]   ;;  %s607_s2 = inlined_call_operand.vmem [shape: f32[1,24], index: 2, kind: input, shape index: {}]   ;;  %s608_s3 = inlined_call_operand.vmem [shape: f32[24,32], index: 3, kind: input, shape index: {}]   ;;  %s609_s4 = inlined_call_operand.vmem [shape: f32[1,32], index: 4, kind: input, shape index: {}]   ;;  %s610_s5 = inlined_call_operand.vmem [shape: f32[32,64], index: 5, kind: input, shape index: {}]   ;;  %s611_s6 = inlined_call_operand.vmem [shape: f32[1,64], index: 6, kind: input, shape index: {}]   ;;  %s612_s7 = inlined_call_operand.vmem [shape: f32[64,16], index: 7, kind: input, shape index: {}]   ;;  %s613_s8 = inlined_call_operand.vmem [shape: f32[1,16], index: 8, kind: input, shape index: {}]   ;;  %s614_s9 = inlined_call_operand.hbm [shape: f32[8,16], index: 9, kind: output, shape index: {}]  }
   0x1   :  { %v33_v0 = vld [vmem:[%s605_s0] sm:$0xff]  ;;  %442 = vset.pattern.permute.xlu0 %v470_v1  ;;  %444 = vset.pattern.permute.xlu1 %v471_v2 }
   0x2   :  { %14 = vsyncpa [#allocation3], 0  ;;  %38 = vperm.xlu0 %442, %v33_v0   ;;  %64 = vperm.xlu1 %444, %v33_v0   ;;  %v472_v3 = vmov 1   ;;  %v74_v4 = vld [vmem:[%s608_s3] sm:$0xff]  ;;  %v75_v5 = vld [vmem:[%s608_s3 + $0x8] sm:$0xff]  ;;  %v473_v7 = vmov 0.0|0.0   ;;  %v41_v10 = vlaneseq }
   0x3   :  { %v415_v6 = vpack.c.bf16 %v75_v5, %v74_v4  ;;  %414 = vmatprep.subr.bf16.mxu1 %v473_v7  ;;  %423 = vmatprep.subr.bf16.mxu0 %v473_v7  ;;  %v474_v8 = vmov 0.0   ;;  %v76_v9 = vld [vmem:[%s608_s3 + $0x10] sm:$0xff]  ;;  %vm475_vm0 = vmmov 0   ;;  %v34_v13 = vld [vmem:[%s606_s1] sm:$0x7]  ;;  %v160_v29 = vld [vmem:[%s610_s5 + $0x8] sm:$0xff] }
   0x4   :  { %381 = vmatprep.mubr.msk.f32.mxu1 %vm475_vm0, %v474_v8  ;;  %411 = vmatprep.mubr.msk.f32.mxu0 %vm475_vm0, %v474_v8  ;;  %v42_v11 = vshrl.u32 %v41_v10, 7  ;;  %v350_v21 = vld [vmem:[%s607_s2] ss:$0 sm:$0xff]  ;;  %vm84_vm1 = vcmask 195584   ;;  %v161_v33 = vld [vmem:[%s610_s5 + $0x10] sm:$0xff]  ;;  %v162_v34 = vld [vmem:[%s610_s5 + $0x18] sm:$0xff] }
   0x5   :  { %416 = vmatpush3.bf16.msra.mxu1 %v415_v6  ;;  %v159_v28 = vld [vmem:[%s610_s5] sm:$0xff]  ;;  %v421_v35 = vpack.c.bf16 %v162_v34, %v161_v33  ;;  %v246_v37 = vld [vmem:[%s612_s7 + $0x8] sm:$0xff]  ;;  %v247_v38 = vld [vmem:[%s612_s7 + $0x10] sm:$0xff]  ;;  %vm170_vm2 = vcmask 261120   ;;  %vm260_vm3 = vcmask 523264   ;;  %s476_s21 = smov [#allocation2]  }
   0x6   :  { %443 = vset.pattern.permute.xlu0 %v472_v3  ;;  %379 = vmatprep.subr.mxu1 %v474_v8  ;;  %v43_v12 = vsub.s32 0, %v42_v11  ;;  %v59_v15 = vsub.s32 1, %v42_v11  ;;  %v69_v16 = vsub.s32 2, %v42_v11  ;;  %v418_v31 = vpack.c.bf16 %v160_v29, %v159_v28  ;;  %v245_v36 = vld [vmem:[%s612_s7] sm:$0xff]  ;;  %v248_v40 = vld [vmem:[%s612_s7 + $0x18] sm:$0xff]  ;;  %v250_v43 = vld [vmem:[%s612_s7 + $0x28] sm:$0xff] }
   0x7   :  { %54 = vperm.xlu0 %443, %v33_v0   ;;  %v424_v39 = vpack.c.bf16 %v246_v37, %v245_v36  ;;  %v427_v41 = vpack.c.bf16 %v248_v40, %v247_v38  ;;  %v249_v42 = vld [vmem:[%s612_s7 + $0x20] sm:$0xff]  ;;  %v251_v50 = vld [vmem:[%s612_s7 + $0x30] sm:$0xff]  ;;  %v252_v51 = vld [vmem:[%s612_s7 + $0x38] sm:$0xff]  ;;  %s342_s2 = sshll.u32 %s476_s21, 4  ;;  %vm334_vm4 = vcmask 130048   ;;  %s343_s2 = int_to_ptr.vmem [resolvable:$true] %s342_s2 }
   0x8   :  { %v44_v14 = vrot.slane %v34_v13, %v43_v12  ;;  %v60_v19 = vrot.slane %v34_v13, %v59_v15  ;;  %v70_v20 = vrot.slane %v34_v13, %v69_v16  ;;  %v430_v44 = vpack.c.bf16 %v250_v43, %v249_v42  ;;  %v351_v45 = vld [vmem:[%s609_s4] ss:$0 sm:$0xff]  ;;  %s446_s7 = scalar_lea.vmem %s343_s2, 128  ;;  %p451_p1 = scmp.lt.s32.totalorder %s343_s2, %s343_s2 }
   0x9   :  { %380 = vmatpush3.msra.mxu1 %v76_v9  ;;  %425 = vmatpush3.bf16.msra.mxu0 %v424_v39  ;;  %v433_v52 = vpack.c.bf16 %v252_v51, %v251_v50  ;;  %v353_v53 = vld [vmem:[%s611_s6] ss:$0 sm:$0xff]  ;;  %p447_p0 = scmp.ne.s32.totalorder %s343_s2, %s446_s7  ;;  %p452_p2 = scmp.lt.s32.totalorder %s446_s7, %s446_s7 }
   0xa   :  { %417 = vmatprep.subr.bf16.mxu1 %v473_v7  ;;  %426 = vmatprep.subr.bf16.mxu0 %v473_v7  ;;  %v355_v58 = vld [vmem:[%s613_s8] ss:$0 sm:$0xff] }
   0xb   :  { %445 = vset.pattern.permute.xlu0 %v471_v2  ;;  %p453_p3 = por %p452_p2, %p451_p1 }
   0xd   :  { %428 = vmatpush3.bf16.msra.mxu0 %v427_v41  ;;  %p454_p4 = pnand %p453_p3, %p447_p0 }
   0xe   :  { %429 = vmatprep.subr.bf16.mxu0 %v473_v7 }
  0x11   :  { %431 = vmatpush3.bf16.msra.mxu0 %v430_v44 }
  0x12   :  { %432 = vmatprep.subr.bf16.mxu0 %v473_v7 }
  0x15   :  { %434 = vmatpush3.bf16.msra.mxu0 %v433_v52 }
  0x81   :  { %v39_v17 = vpop.permute.xlu0 %38  ;;  %v65_v22 = vpop.permute.xlu1 %64 }
  0x82   :  { %v45_v18 = vmul.f32 %v44_v14, %v39_v17  ;;  %v71_v26 = vmul.f32 %v70_v20, %v65_v22 }
  0x84   :  { %v52_v24 = vadd.f32 %v350_v21, %v45_v18 }
  0x86   :  { %v55_v23 = vpop.permute.xlu0 %54 }
  0x87   :  { %v61_v25 = vmul.f32 %v60_v19, %v55_v23 }
  0x89   :  { %v62_v27 = vadd.f32 %v61_v25, %v52_v24 }
  0x8b   :  { %v72_v30 = vadd.f32 %v71_v26, %v62_v27 }
  0x8d   :  { %v73_v32 = vmax.f32 %v72_v30, 0.0 }
  0x8f   :  { %382 = vmatmul.mubr.msk.f32.vlgmr.msra.gmra.mrb[0].mxu1 %vm84_vm1, %v73_v32 }
  0x90   :  { %419 = vmatpush3.bf16.msra.mxu1 %v418_v31  ;;  %392 = vmatprep.mubr.msk.f32.mxu1 %vm475_vm0, %v474_v8 }
  0x91   :  { %420 = vmatprep.subr.bf16.mxu1 %v473_v7 }
  0x94   :  { %422 = vmatpush3.bf16.msra.mxu1 %v421_v35 }
 0x162   :  { %v154_v46 = vpop.f32.mrb[0].mxu1 }
 0x163   :  { %v155_v47 = vadd.f32 %v351_v45, %v154_v46  ;;  %v383_v48 = vpop.f32.mrb[1].mxu1 }
 0x165   :  { %v158_v49 = vmax.f32 %v155_v47, 0.0 }
 0x167   :  { %393 = vmatmul.mubr.msk.f32.vlgmr.msra.gmra.mrb[2].mxu1 %vm170_vm2, %v158_v49 }
 0x23a   :  { %v240_v54 = vpop.f32.mrb[2].mxu1 }
 0x23b   :  { %v241_v55 = vadd.f32 %v353_v53, %v240_v54  ;;  %v394_v56 = vpop.f32.mrb[3].mxu1 }
 0x23d   :  { %v244_v57 = vmax.f32 %v241_v55, 0.0 }
 0x23f   :  { %412 = vmatmul.mubr.msk.f32.vlgmr.msra.gmra.mrb[0].mxu0 %vm260_vm3, %v244_v57 }
 0x312   :  { %v330_v59 = vpop.f32.mrb[0].mxu0 }
 0x313   :  { %v331_v60 = vadd.f32 %v355_v58, %v330_v59  ;;  %v413_v61 = vpop.f32.mrb[1].mxu0 }
 0x315   :  { %335 = vst.msk [vmem:[#allocation2] sm:$0xff] %vm334_vm4, %v331_v60 }
 0x316   :  { %457 = shalt.err (!%p454_p4)
}
 0x317   :  { %s458_s23 = scalar_lea.hbm %s614_s9, 128 }
 0x318   :  { %p459_p5 = scmp.ne.s32.totalorder %s614_s9, %s458_s23  ;;  %p462_p6 = scmp.lt.u32.totalorder %s458_s23, %s614_s9 }
 0x31a   :  { %p464_p7 = pnand %p462_p6, %p459_p5 }
 0x31c   :  { %467 = shalt.err (!%p464_p7)
}
 0x31d   :  { %345 = dma.vmem_to_hbm [thread:$0]  %s343_s2, 128, %s614_s9, [#allocation3]  }
 0x31e   :  { %468 = dma.done.wait [#allocation3], 128  }
 0x31f   :  { %469 = vsyncadd [#allocation3], 4294967168 }
 0x320   :  { %349 = vsyncpa [#allocation3], 1 }

</bundles_post_ra>
